<compile_context>
chip_gen: v7x
topology: tpu7x:2x2x1
jax: 0.10.0
libtpu: 0.0.40
codegen_flags: <defaults>
</compile_context>

<pallas_src>
import functools

import jax
import jax.numpy as jnp
from jax.experimental import pallas as pl
from jax.experimental.pallas import tpu as pltpu


def _disc_kernel(x_ref, c_ref, w1x_ref, w1c_ref, b1_ref, w2_ref, b2_ref,
                 w3_ref, b3_ref, o_ref):
    # ----- Layer 1: Linear(input_dim + condition_dim -> 512) + LeakyReLU(0.2)
    # Fused concat: two bf16 MXU dots accumulated in f32.
    h1 = jnp.dot(x_ref[...], w1x_ref[...], preferred_element_type=jnp.float32)
    h1 = h1 + jnp.dot(c_ref[...], w1c_ref[...],
                      preferred_element_type=jnp.float32)
    h1 = h1 + b1_ref[...]                      # f32 bias (VPU)
    h1 = jnp.where(h1 > 0, h1, 0.2 * h1)       # f32 LeakyReLU (VPU)

    # ----- Layer 2: Linear(512 -> 256) + LeakyReLU(0.2)
    h2 = jnp.dot(h1.astype(jnp.bfloat16), w2_ref[...],
                 preferred_element_type=jnp.float32)
    h2 = h2 + b2_ref[...]
    h2 = jnp.where(h2 > 0, h2, 0.2 * h2)

    # ----- Layer 3: Linear(256 -> 1). N=1 matmul is wasteful on the MXU, so do
    # a VPU multiply + lane reduction instead; b3 is an SMEM scalar.
    out = jnp.sum(h2 * w3_ref[...], axis=-1, keepdims=True) + b3_ref[0, 0]
    o_ref[...] = out.astype(o_ref.dtype)


def _round_up(x, m):
    return ((x + m - 1) // m) * m


@functools.partial(jax.jit, static_argnames=("tile_b",))
def discriminator_forward(x, conditions, params, *, tile_b=256):
    """x: [B, input_dim], conditions: [B, condition_dim] -> [B, 1] (float32)."""
    w1, b1, w2, b2, w3, b3 = params
    B, Dx = x.shape
    _, Dc = conditions.shape
    H1 = w1.shape[1]
    H2 = w2.shape[1]

    # Batch tiling: pad B up to a multiple of the tile (sublane-aligned).
    TB = min(tile_b, _round_up(B, 8))
    B_pad = _round_up(B, TB)
    if B_pad != B:
        x = jnp.pad(x, ((0, B_pad - B), (0, 0)))
        conditions = jnp.pad(conditions, ((0, B_pad - B), (0, 0)))
    grid = (B_pad // TB,)

    # Split w1 for the fused concat; ship bf16 MXU operands, f32 everything else.
    w1x = w1[:Dx].astype(jnp.bfloat16)
    w1c = w1[Dx:].astype(jnp.bfloat16)
    w2_bf = w2.astype(jnp.bfloat16)
    w3_row = w3.reshape(1, H2).astype(jnp.float32)   # [1, 256] row for VPU path
    b3_s = b3.reshape(1, 1).astype(jnp.float32)      # SMEM scalar
    x_bf = x.astype(jnp.bfloat16)
    c_bf = conditions.astype(jnp.bfloat16)

    const = lambda shape: pl.BlockSpec(shape, lambda i: tuple(0 for _ in shape))

    flops = 2 * B_pad * (Dx * H1 + Dc * H1 + H1 * H2 + H2)
    bytes_accessed = (
        B_pad * (Dx + Dc) * 2            # bf16 activations in
        + (Dx + Dc) * H1 * 2 + H1 * H2 * 2   # bf16 weights
        + (H1 + H2 + H2 + 1) * 4         # f32 biases + w3 row
        + B_pad * 4                      # f32 output
    )

    out = pl.pallas_call(
        _disc_kernel,
        out_shape=jax.ShapeDtypeStruct((B_pad, 1), jnp.float32),
        grid=grid,
        in_specs=[
            pl.BlockSpec((TB, Dx), lambda i: (i, 0)),     # x tile (streamed)
            pl.BlockSpec((TB, Dc), lambda i: (i, 0)),     # cond tile (streamed)
            const((Dx, H1)),                              # w1_x (VMEM-resident)
            const((Dc, H1)),                              # w1_cond
            const((1, H1)),                               # b1
            const((H1, H2)),                              # w2
            const((1, H2)),                               # b2
            const((1, H2)),                               # w3 row
            pl.BlockSpec(memory_space=pltpu.MemorySpace.SMEM),  # b3 scalar
        ],
        out_specs=pl.BlockSpec((TB, 1), lambda i: (i, 0)),
        compiler_params=pltpu.CompilerParams(
            dimension_semantics=("parallel",),            # megacore on v7x
        ),
        cost_estimate=pl.CostEstimate(
            flops=flops, transcendentals=0, bytes_accessed=bytes_accessed),
    )(x_bf, c_bf, w1x, w1c, b1, w2_bf, b2, w3_row, b3_s)

    return out[:B]


def init_params(key, input_dim, condition_dim):
    """Deterministic init mirroring nn.Linear default (uniform +-1/sqrt(fan_in))."""
    in_dim = input_dim + condition_dim
    dims = [(in_dim, 512), (512, 256), (256, 1)]
    params = []
    for (fan_in, fan_out) in dims:
        key, kw, kb = jax.random.split(key, 3)
        bound = 1.0 / jnp.sqrt(fan_in)
        w = jax.random.uniform(kw, (fan_in, fan_out), jnp.float32, -bound, bound)
        b = jax.random.uniform(kb, (1, fan_out), jnp.float32, -bound, bound)
        params.extend([w, b])
    return tuple(params)


def reference_forward(x, conditions, params):
    """Pure-JAX f32 reference matching the PyTorch module semantics."""
    w1, b1, w2, b2, w3, b3 = params
    h = jnp.concatenate((x, conditions), axis=1)
    h = h @ w1 + b1
    h = jnp.where(h > 0, h, 0.2 * h)
    h = h @ w2 + b2
    h = jnp.where(h > 0, h, 0.2 * h)
    return h @ w3 + b3


if __name__ == "__main__":
    B, input_dim, condition_dim = 8, 32, 16
    key = jax.random.PRNGKey(0)
    kx, kc, kp = jax.random.split(key, 3)

    x = jax.random.normal(kx, (B, input_dim), jnp.float32)
    conditions = jax.random.normal(kc, (B, condition_dim), jnp.float32)
    params = init_params(kp, input_dim, condition_dim)

    out = discriminator_forward(x, conditions, params)
    out = jax.block_until_ready(out)

    ref = reference_forward(x, conditions, params)
    assert out.shape == (B, 1), out.shape
    # bf16 MXU operands (f32 accumulation) -> looser tolerance vs the f32 reference.
    assert jnp.allclose(out, ref, atol=2e-2, rtol=2e-2), (out, ref)
    print("KERNEL_OK")
</pallas_src>

<mosaic_0001>
module attributes {stable_mosaic.version = 11 : i64} {
  func.func @_disc_kernel(%arg0: i32, %arg1: memref<8x32xbf16, #tpu.memory_space<vmem>>, %arg2: memref<8x16xbf16, #tpu.memory_space<vmem>>, %arg3: memref<32x512xbf16, #tpu.memory_space<vmem>>, %arg4: memref<16x512xbf16, #tpu.memory_space<vmem>>, %arg5: memref<1x512xf32, #tpu.memory_space<vmem>>, %arg6: memref<512x256xbf16, #tpu.memory_space<vmem>>, %arg7: memref<1x256xf32, #tpu.memory_space<vmem>>, %arg8: memref<1x256xf32, #tpu.memory_space<vmem>>, %arg9: memref<1x1xf32, #tpu.memory_space<smem>>, %arg10: memref<8x1xf32, #tpu.memory_space<vmem>>) attributes {dimension_semantics = [#tpu.dimension_semantics<parallel>], iteration_bounds = array<i64: 1>, scalar_prefetch = 0 : i64, scratch_operands = 0 : i64, tpu.core_type = #tpu.core_type<tc>, window_params = [{transform_indices = @transform_0, window_bounds = array<i64: 8, 32>}, {transform_indices = @transform_1, window_bounds = array<i64: 8, 16>}, {pipeline_mode = #tpu.pipeline_mode<synchronous>, transform_indices = @transform_2, window_bounds = array<i64: 32, 512>}, {pipeline_mode = #tpu.pipeline_mode<synchronous>, transform_indices = @transform_3, window_bounds = array<i64: 16, 512>}, {pipeline_mode = #tpu.pipeline_mode<synchronous>, transform_indices = @transform_4, window_bounds = array<i64: 1, 512>}, {pipeline_mode = #tpu.pipeline_mode<synchronous>, transform_indices = @transform_5, window_bounds = array<i64: 512, 256>}, {pipeline_mode = #tpu.pipeline_mode<synchronous>, transform_indices = @transform_6, window_bounds = array<i64: 1, 256>}, {pipeline_mode = #tpu.pipeline_mode<synchronous>, transform_indices = @transform_7, window_bounds = array<i64: 1, 256>}, {transform_indices = @transform_8, window_bounds = array<i64: 1, 1>}, {transform_indices = @transform_9, window_bounds = array<i64: 8, 1>}]} {
    %c0 = arith.constant 0 : index
    %c0_0 = arith.constant 0 : index
    %0 = vector.load %arg1[%c0, %c0_0] : memref<8x32xbf16, #tpu.memory_space<vmem>>, vector<8x32xbf16>
    %c0_1 = arith.constant 0 : index
    %c0_2 = arith.constant 0 : index
    %1 = vector.load %arg3[%c0_1, %c0_2] : memref<32x512xbf16, #tpu.memory_space<vmem>>, vector<32x512xbf16>
    %cst = arith.constant dense<0.000000e+00> : vector<8x512xf32>
    %2 = tpu.matmul %0, %1, %cst {dimension_numbers = #tpu.dot_dimension_numbers<[1], [0], [0], [1], [0, 0, 1, 1], [], []>} : vector<8x32xbf16>, vector<32x512xbf16>, vector<8x512xf32> -> vector<8x512xf32>
    %c0_3 = arith.constant 0 : index
    %c0_4 = arith.constant 0 : index
    %3 = vector.load %arg2[%c0_3, %c0_4] : memref<8x16xbf16, #tpu.memory_space<vmem>>, vector<8x16xbf16>
    %c0_5 = arith.constant 0 : index
    %c0_6 = arith.constant 0 : index
    %4 = vector.load %arg4[%c0_5, %c0_6] : memref<16x512xbf16, #tpu.memory_space<vmem>>, vector<16x512xbf16>
    %cst_7 = arith.constant dense<0.000000e+00> : vector<8x512xf32>
    %5 = tpu.matmul %3, %4, %cst_7 {dimension_numbers = #tpu.dot_dimension_numbers<[1], [0], [0], [1], [0, 0, 1, 1], [], []>} : vector<8x16xbf16>, vector<16x512xbf16>, vector<8x512xf32> -> vector<8x512xf32>
    %6 = arith.addf %2, %5 : vector<8x512xf32>
    %c0_8 = arith.constant 0 : index
    %c0_9 = arith.constant 0 : index
    %7 = vector.load %arg5[%c0_8, %c0_9] : memref<1x512xf32, #tpu.memory_space<vmem>>, vector<1x512xf32>
    %8 = vector.broadcast %7 : vector<1x512xf32> to vector<8x512xf32>
    %9 = arith.addf %6, %8 : vector<8x512xf32>
    %cst_10 = arith.constant 0.000000e+00 : f32
    %10 = vector.broadcast %cst_10 : f32 to vector<8x512xf32>
    %11 = arith.cmpf ogt, %9, %10 : vector<8x512xf32>
    %cst_11 = arith.constant 2.000000e-01 : f32
    %12 = vector.broadcast %cst_11 : f32 to vector<8x512xf32>
    %13 = arith.mulf %12, %9 : vector<8x512xf32>
    %14 = arith.select %11, %9, %13 : vector<8x512xi1>, vector<8x512xf32>
    %15 = arith.truncf %14 : vector<8x512xf32> to vector<8x512xbf16>
    %c0_12 = arith.constant 0 : index
    %c0_13 = arith.constant 0 : index
    %16 = vector.load %arg6[%c0_12, %c0_13] : memref<512x256xbf16, #tpu.memory_space<vmem>>, vector<512x256xbf16>
    %cst_14 = arith.constant dense<0.000000e+00> : vector<8x256xf32>
    %17 = tpu.matmul %15, %16, %cst_14 {dimension_numbers = #tpu.dot_dimension_numbers<[1], [0], [0], [1], [0, 0, 1, 1], [], []>} : vector<8x512xbf16>, vector<512x256xbf16>, vector<8x256xf32> -> vector<8x256xf32>
    %c0_15 = arith.constant 0 : index
    %c0_16 = arith.constant 0 : index
    %18 = vector.load %arg7[%c0_15, %c0_16] : memref<1x256xf32, #tpu.memory_space<vmem>>, vector<1x256xf32>
    %19 = vector.broadcast %18 : vector<1x256xf32> to vector<8x256xf32>
    %20 = arith.addf %17, %19 : vector<8x256xf32>
    %cst_17 = arith.constant 0.000000e+00 : f32
    %21 = vector.broadcast %cst_17 : f32 to vector<8x256xf32>
    %22 = arith.cmpf ogt, %20, %21 : vector<8x256xf32>
    %cst_18 = arith.constant 2.000000e-01 : f32
    %23 = vector.broadcast %cst_18 : f32 to vector<8x256xf32>
    %24 = arith.mulf %23, %20 : vector<8x256xf32>
    %25 = arith.select %22, %20, %24 : vector<8x256xi1>, vector<8x256xf32>
    %c0_19 = arith.constant 0 : index
    %c0_20 = arith.constant 0 : index
    %26 = vector.load %arg8[%c0_19, %c0_20] : memref<1x256xf32, #tpu.memory_space<vmem>>, vector<1x256xf32>
    %27 = vector.broadcast %26 : vector<1x256xf32> to vector<8x256xf32>
    %28 = arith.mulf %25, %27 : vector<8x256xf32>
    %cst_21 = arith.constant dense<0.000000e+00> : vector<8xf32>
    %29 = vector.multi_reduction <add>, %28, %cst_21 [1] : vector<8x256xf32> to vector<8xf32>
    %30 = vector.shape_cast %29 : vector<8xf32> to vector<8x1xf32>
    %c0_22 = arith.constant 0 : index
    %c0_23 = arith.constant 0 : index
    %31 = memref.load %arg9[%c0_22, %c0_23] : memref<1x1xf32, #tpu.memory_space<smem>>
    %32 = vector.broadcast %31 : f32 to vector<8x1xf32>
    %33 = arith.addf %30, %32 : vector<8x1xf32>
    %c0_24 = arith.constant 0 : index
    %c0_25 = arith.constant 0 : index
    %34 = vector.load %arg10[%c0_24, %c0_25] : memref<8x1xf32, #tpu.memory_space<vmem>>, vector<8x1xf32>
    tpu.vector_store %arg10[%c0_24, %c0_25], %33 {strides = array<i32>} : memref<8x1xf32, #tpu.memory_space<vmem>>, vector<8x1xf32>,
    return
  }
  func.func @transform_0(%arg0: i32) -> (i32, i32) {
    %c0_i32 = arith.constant 0 : i32
    %c0_i32_0 = arith.constant 0 : i32
    return %arg0, %c0_i32 : i32, i32
  }
  func.func @transform_1(%arg0: i32) -> (i32, i32) {
    %c0_i32 = arith.constant 0 : i32
    %c0_i32_0 = arith.constant 0 : i32
    return %arg0, %c0_i32 : i32, i32
  }
  func.func @transform_2(%arg0: i32) -> (i32, i32) {
    %c0_i32 = arith.constant 0 : i32
    %c0_i32_0 = arith.constant 0 : i32
    %c0_i32_1 = arith.constant 0 : i32
    return %c0_i32, %c0_i32_0 : i32, i32
  }
  func.func @transform_3(%arg0: i32) -> (i32, i32) {
    %c0_i32 = arith.constant 0 : i32
    %c0_i32_0 = arith.constant 0 : i32
    %c0_i32_1 = arith.constant 0 : i32
    return %c0_i32, %c0_i32_0 : i32, i32
  }
  func.func @transform_4(%arg0: i32) -> (i32, i32) {
    %c0_i32 = arith.constant 0 : i32
    %c0_i32_0 = arith.constant 0 : i32
    %c0_i32_1 = arith.constant 0 : i32
    return %c0_i32, %c0_i32_0 : i32, i32
  }
  func.func @transform_5(%arg0: i32) -> (i32, i32) {
    %c0_i32 = arith.constant 0 : i32
    %c0_i32_0 = arith.constant 0 : i32
    %c0_i32_1 = arith.constant 0 : i32
    return %c0_i32, %c0_i32_0 : i32, i32
  }
  func.func @transform_6(%arg0: i32) -> (i32, i32) {
    %c0_i32 = arith.constant 0 : i32
    %c0_i32_0 = arith.constant 0 : i32
    %c0_i32_1 = arith.constant 0 : i32
    return %c0_i32, %c0_i32_0 : i32, i32
  }
  func.func @transform_7(%arg0: i32) -> (i32, i32) {
    %c0_i32 = arith.constant 0 : i32
    %c0_i32_0 = arith.constant 0 : i32
    %c0_i32_1 = arith.constant 0 : i32
    return %c0_i32, %c0_i32_0 : i32, i32
  }
  func.func @transform_8(%arg0: i32) -> (i32, i32) {
    %c0_i32 = arith.constant 0 : i32
    %c0_i32_0 = arith.constant 0 : i32
    %c0_i32_1 = arith.constant 0 : i32
    return %c0_i32, %c0_i32_0 : i32, i32
  }
  func.func @transform_9(%arg0: i32) -> (i32, i32) {
    %c0_i32 = arith.constant 0 : i32
    %c0_i32_0 = arith.constant 0 : i32
    return %arg0, %c0_i32 : i32, i32
  }
}

</mosaic_0001>

<bundles_post_ra>
// kernel: discriminator_forward.1
= control target key start
LH: loop header
LB: loop body
LE: loop exit
PB: predicated region body
PF: predicated region fallthrough
CT: control target
= control target key end

     0   :  { %v1031_v1 = vmov 0   ;;  %vm68_vm0 = vcmask 130048   ;;  %vm194_vm1 = vcmask 261120   ;;  %vm826_vm8 = vcmask 7168   ;;  %s1341_s3 = inlined_call_operand.vmem [shape: bf16[16,512], index: 3, kind: input, shape index: {}]   ;;  %s1342_s1 = inlined_call_operand.vmem [shape: bf16[8,16], index: 1, kind: input, shape index: {}]   ;;  %s1343_s2 = inlined_call_operand.vmem [shape: bf16[32,512], index: 2, kind: input, shape index: {}]   ;;  %s1344_s5 = inlined_call_operand.vmem [shape: bf16[512,256], index: 5, kind: input, shape index: {}]   ;;  %s1345_s0 = inlined_call_operand.vmem [shape: bf16[8,32], index: 0, kind: input, shape index: {}]   ;;  %s1346_s4 = inlined_call_operand.vmem [shape: f32[1,512], index: 4, kind: input, shape index: {}]   ;;  %s1347_s6 = inlined_call_operand.vmem [shape: f32[1,256], index: 6, kind: input, shape index: {}]   ;;  %s1348_s7 = inlined_call_operand.vmem [shape: f32[1,256], index: 7, kind: input, shape index: {}]   ;;  %s1349_s8 = inlined_call_operand.<no memory space> [shape: f32[1,1], index: 8, kind: input, shape index: {}]   ;;  %s1350_s9 = inlined_call_operand.vmem [shape: f32[8,1], index: 9, kind: output, shape index: {}]  }
   0x1   :  { %v917_v0 = vld [vmem:[%s1341_s3 + $0x4] ss:$16 sps:$4 sm:$0xff]   ;;  %104 = vmatprep.mubr.bf16.mxu0 %v1031_v1  ;;  %145 = vmatprep.mubr.bf16.mxu1 %v1031_v1  ;;  %v919_v2 = vld [vmem:[%s1341_s3 + $0xc] ss:$16 sps:$4 sm:$0xff]   ;;  %v921_v3 = vld [vmem:[%s1341_s3] ss:$16 sps:$4 sm:$0xff]  }
   0x2   :  { %72 = vmatprep.subr.bf16.mxu0 %v917_v0  ;;  %v922_v4 = vld [vmem:[%s1341_s3 + $0x8] ss:$16 sps:$4 sm:$0xff]   ;;  %v43_v5 = vld [vmem:[%s1342_s1] sm:$0xf]  ;;  %113 = vmatprep.subr.bf16.mxu1 %v919_v2  ;;  %v925_v7 = vld [vmem:[%s1343_s2 + $0x4] ss:$16 sps:$4 sm:$0xff]  }
   0x3   :  { %v923_v6 = vld [vmem:[%s1343_s2] ss:$16 sps:$4 sm:$0xff]   ;;  %73 = vmatpush1.bf16.msra.mxu0 %v921_v3  ;;  %114 = vmatpush1.bf16.msra.mxu1 %v922_v4  ;;  %v926_v8 = vld [vmem:[%s1343_s2 + $0x8] ss:$16 sps:$4 sm:$0xff]   ;;  %v928_v9 = vld [vmem:[%s1343_s2 + $0xc] ss:$16 sps:$4 sm:$0xff]  }
   0x4   :  { %198 = vmatprep.subr.bf16.mxu0 %v925_v7  ;;  %v931_v10 = vld [vmem:[%s1343_s2 + $0x24] ss:$16 sps:$4 sm:$0xff]   ;;  %239 = vmatprep.subr.bf16.mxu1 %v928_v9  ;;  %v929_v11 = vld [vmem:[%s1343_s2 + $0x20] ss:$16 sps:$4 sm:$0xff]   ;;  %v934_v12 = vld [vmem:[%s1343_s2 + $0x2c] ss:$16 sps:$4 sm:$0xff]  }
   0x5   :  { %v932_v13 = vld [vmem:[%s1343_s2 + $0x28] ss:$16 sps:$4 sm:$0xff]   ;;  %v937_v14 = vld [vmem:[%s1344_s5 + $0x4] ss:$8 sps:$4 sm:$0xff]   ;;  %v34_v16 = vld [vmem:[%s1345_s0] sm:$0xf] }
   0x6   :  { %836 = vmatmul.mubr.msk.bf16.vlgmr.msra.gmra.mrb[0].mxu0 %vm68_vm0, %v43_v5  ;;  %837 = vmatmul.mubr.msk.bf16.vlgmr.msra.gmra.mrb[0].mxu1 %vm68_vm0, %v43_v5  ;;  %v940_v15 = vld [vmem:[%s1344_s5 + $0x104] ss:$8 sps:$4 sm:$0xff]   ;;  %v938_v17 = vld [vmem:[%s1344_s5 + $0x100] ss:$8 sps:$4 sm:$0xff]   ;;  %v946_v19 = vld [vmem:[%s1344_s5 + $0x114] ss:$8 sps:$4 sm:$0xff]  }
   0x7   :  { %199 = vmatpush1.bf16.msra.mxu0 %v923_v6  ;;  %240 = vmatpush1.bf16.msra.mxu1 %v926_v8  ;;  %v935_v18 = vld [vmem:[%s1344_s5] ss:$8 sps:$4 sm:$0xff]   ;;  %v943_v20 = vld [vmem:[%s1344_s5 + $0x14] ss:$8 sps:$4 sm:$0xff]   ;;  %v944_v21 = vld [vmem:[%s1344_s5 + $0x110] ss:$8 sps:$4 sm:$0xff]  }
   0x8   :  { %200 = vmatprep.subr.bf16.mxu0 %v931_v10  ;;  %241 = vmatprep.subr.bf16.mxu1 %v934_v12  ;;  %v941_v22 = vld [vmem:[%s1344_s5 + $0x10] ss:$8 sps:$4 sm:$0xff]   ;;  %v952_v23 = vld [vmem:[%s1344_s5 + $0x124] ss:$8 sps:$4 sm:$0xff]   ;;  %v950_v25 = vld [vmem:[%s1344_s5 + $0x120] ss:$8 sps:$4 sm:$0xff]  }
   0x9   :  { %230 = vmatprep.mubr.bf16.mxu0 %v1031_v1  ;;  %271 = vmatprep.mubr.bf16.mxu1 %v1031_v1  ;;  %v949_v24 = vld [vmem:[%s1344_s5 + $0x24] ss:$8 sps:$4 sm:$0xff]   ;;  %v947_v26 = vld [vmem:[%s1344_s5 + $0x20] ss:$8 sps:$4 sm:$0xff]   ;;  %v958_v27 = vld [vmem:[%s1344_s5 + $0x134] ss:$8 sps:$4 sm:$0xff]  }
   0xa   :  { %v955_v28 = vld [vmem:[%s1344_s5 + $0x34] ss:$8 sps:$4 sm:$0xff]   ;;  %v956_v29 = vld [vmem:[%s1344_s5 + $0x130] ss:$8 sps:$4 sm:$0xff]   ;;  %v964_v31 = vld [vmem:[%s1344_s5 + $0x144] ss:$8 sps:$4 sm:$0xff]  }
   0xb   :  { %201 = vmatpush1.bf16.msra.mxu0 %v929_v11  ;;  %242 = vmatpush1.bf16.msra.mxu1 %v932_v13  ;;  %v953_v30 = vld [vmem:[%s1344_s5 + $0x30] ss:$8 sps:$4 sm:$0xff]   ;;  %v961_v32 = vld [vmem:[%s1344_s5 + $0x44] ss:$8 sps:$4 sm:$0xff]   ;;  %v962_v33 = vld [vmem:[%s1344_s5 + $0x140] ss:$8 sps:$4 sm:$0xff]  }
   0xc   :  { %759 = vmatprep.subr.bf16.mxu0 %v940_v15  ;;  %718 = vmatprep.subr.bf16.mxu1 %v937_v14  ;;  %v959_v34 = vld [vmem:[%s1344_s5 + $0x40] ss:$8 sps:$4 sm:$0xff]   ;;  %v970_v35 = vld [vmem:[%s1344_s5 + $0x154] ss:$8 sps:$4 sm:$0xff]   ;;  %v968_v37 = vld [vmem:[%s1344_s5 + $0x150] ss:$8 sps:$4 sm:$0xff]   ;;  %v282_v15 = vlaneseq }
   0xd   :  { %v967_v36 = vld [vmem:[%s1344_s5 + $0x54] ss:$8 sps:$4 sm:$0xff]   ;;  %v965_v38 = vld [vmem:[%s1344_s5 + $0x50] ss:$8 sps:$4 sm:$0xff]   ;;  %v976_v39 = vld [vmem:[%s1344_s5 + $0x164] ss:$8 sps:$4 sm:$0xff]  }
   0xe   :  { %846 = vmatmul.mubr.msk.bf16.vlgmr.msra.gmra.mrb[4].mxu0 %vm194_vm1, %v34_v16  ;;  %847 = vmatmul.mubr.msk.bf16.vlgmr.msra.gmra.mrb[4].mxu1 %vm194_vm1, %v34_v16  ;;  %v973_v40 = vld [vmem:[%s1344_s5 + $0x64] ss:$8 sps:$4 sm:$0xff]   ;;  %v971_v41 = vld [vmem:[%s1344_s5 + $0x60] ss:$8 sps:$4 sm:$0xff]   ;;  %v979_v43 = vld [vmem:[%s1344_s5 + $0x74] ss:$8 sps:$4 sm:$0xff]  }
   0xf   :  { %760 = vmatpush1.bf16.msra.mxu0 %v938_v17  ;;  %719 = vmatpush1.bf16.msra.mxu1 %v935_v18  ;;  %v974_v42 = vld [vmem:[%s1344_s5 + $0x160] ss:$8 sps:$4 sm:$0xff]   ;;  %v982_v44 = vld [vmem:[%s1344_s5 + $0x174] ss:$8 sps:$4 sm:$0xff]   ;;  %v980_v45 = vld [vmem:[%s1344_s5 + $0x170] ss:$8 sps:$4 sm:$0xff]  }
  0x10   :  { %761 = vmatprep.subr.bf16.mxu0 %v946_v19  ;;  %720 = vmatprep.subr.bf16.mxu1 %v943_v20  ;;  %v977_v46 = vld [vmem:[%s1344_s5 + $0x70] ss:$8 sps:$4 sm:$0xff]   ;;  %v988_v47 = vld [vmem:[%s1344_s5 + $0x184] ss:$8 sps:$4 sm:$0xff]   ;;  %v986_v49 = vld [vmem:[%s1344_s5 + $0x180] ss:$8 sps:$4 sm:$0xff]  }
  0x11   :  { %v985_v48 = vld [vmem:[%s1344_s5 + $0x84] ss:$8 sps:$4 sm:$0xff]   ;;  %v983_v50 = vld [vmem:[%s1344_s5 + $0x80] ss:$8 sps:$4 sm:$0xff]   ;;  %v994_v51 = vld [vmem:[%s1344_s5 + $0x194] ss:$8 sps:$4 sm:$0xff]  }
  0x12   :  { %v991_v52 = vld [vmem:[%s1344_s5 + $0x94] ss:$8 sps:$4 sm:$0xff]   ;;  %v992_v53 = vld [vmem:[%s1344_s5 + $0x190] ss:$8 sps:$4 sm:$0xff]   ;;  %v1000_v55 = vld [vmem:[%s1344_s5 + $0x1a4] ss:$8 sps:$4 sm:$0xff]  }
  0x13   :  { %762 = vmatpush1.bf16.msra.mxu0 %v944_v21  ;;  %721 = vmatpush1.bf16.msra.mxu1 %v941_v22  ;;  %v989_v54 = vld [vmem:[%s1344_s5 + $0x90] ss:$8 sps:$4 sm:$0xff]   ;;  %v997_v56 = vld [vmem:[%s1344_s5 + $0xa4] ss:$8 sps:$4 sm:$0xff]   ;;  %v998_v57 = vld [vmem:[%s1344_s5 + $0x1a0] ss:$8 sps:$4 sm:$0xff]  }
  0x14   :  { %763 = vmatprep.subr.bf16.mxu0 %v952_v23  ;;  %722 = vmatprep.subr.bf16.mxu1 %v949_v24  ;;  %v995_v58 = vld [vmem:[%s1344_s5 + $0xa0] ss:$8 sps:$4 sm:$0xff]   ;;  %v1003_v59 = vld [vmem:[%s1344_s5 + $0xb4] ss:$8 sps:$4 sm:$0xff]   ;;  %v1001_v61 = vld [vmem:[%s1344_s5 + $0xb0] ss:$8 sps:$4 sm:$0xff]  }
  0x15   :  { %v1006_v60 = vld [vmem:[%s1344_s5 + $0x1b4] ss:$8 sps:$4 sm:$0xff]   ;;  %v1004_v62 = vld [vmem:[%s1344_s5 + $0x1b0] ss:$8 sps:$4 sm:$0xff]   ;;  %v1007_v63 = vld [vmem:[%s1344_s5 + $0xc0] ss:$8 sps:$4 sm:$0xff]  }
  0x16   :  { %v1009_v0 = vld [vmem:[%s1344_s5 + $0xc4] ss:$8 sps:$4 sm:$0xff]   ;;  %v1010_v1 = vld [vmem:[%s1344_s5 + $0x1c0] ss:$8 sps:$4 sm:$0xff]   ;;  %v1015_v3 = vld [vmem:[%s1344_s5 + $0xd4] ss:$8 sps:$4 sm:$0xff]  }
  0x17   :  { %764 = vmatpush1.bf16.msra.mxu0 %v950_v25  ;;  %723 = vmatpush1.bf16.msra.mxu1 %v947_v26  ;;  %v1012_v2 = vld [vmem:[%s1344_s5 + $0x1c4] ss:$8 sps:$4 sm:$0xff]   ;;  %v1018_v4 = vld [vmem:[%s1344_s5 + $0x1d4] ss:$8 sps:$4 sm:$0xff]   ;;  %v1013_v5 = vld [vmem:[%s1344_s5 + $0xd0] ss:$8 sps:$4 sm:$0xff]  }
  0x18   :  { %765 = vmatprep.subr.bf16.mxu0 %v958_v27  ;;  %724 = vmatprep.subr.bf16.mxu1 %v955_v28  ;;  %v1016_v6 = vld [vmem:[%s1344_s5 + $0x1d0] ss:$8 sps:$4 sm:$0xff]   ;;  %v1021_v7 = vld [vmem:[%s1344_s5 + $0xe4] ss:$8 sps:$4 sm:$0xff]   ;;  %v1019_v9 = vld [vmem:[%s1344_s5 + $0xe0] ss:$8 sps:$4 sm:$0xff]  }
  0x19   :  { %v1024_v8 = vld [vmem:[%s1344_s5 + $0x1e4] ss:$8 sps:$4 sm:$0xff]   ;;  %v1022_v10 = vld [vmem:[%s1344_s5 + $0x1e0] ss:$8 sps:$4 sm:$0xff]   ;;  %v1027_v11 = vld [vmem:[%s1344_s5 + $0xf4] ss:$8 sps:$4 sm:$0xff]  }
  0x1a   :  { %v1030_v12 = vld [vmem:[%s1344_s5 + $0x1f4] ss:$8 sps:$4 sm:$0xff]   ;;  %v1025_v13 = vld [vmem:[%s1344_s5 + $0xf0] ss:$8 sps:$4 sm:$0xff]   ;;  %v283_v16 = vshrl.u32 %v282_v15, 7 }
  0x1b   :  { %766 = vmatpush1.bf16.msra.mxu0 %v956_v29  ;;  %725 = vmatpush1.bf16.msra.mxu1 %v953_v30  ;;  %v1028_v14 = vld [vmem:[%s1344_s5 + $0x1f0] ss:$8 sps:$4 sm:$0xff]   ;;  %v280_v26 = vld [vmem:[%s1346_s4] sm:$0xf] }
  0x1c   :  { %767 = vmatprep.subr.bf16.mxu0 %v964_v31  ;;  %726 = vmatprep.subr.bf16.mxu1 %v961_v32  ;;  %v1316_v25 = vsub.s32 0, %v283_v16  ;;  %v292_v27 = vsub.s32 2, %v283_v16  ;;  %v1321_v28 = vsub.s32 1, %v283_v16  ;;  %v296_v29 = vsub.s32 3, %v283_v16 }
  0x1e   :  { %v285_v30 = vrot.slane %v280_v26, %v1316_v25  ;;  %v293_v32 = vrot.slane %v280_v26, %v292_v27 }
  0x1f   :  { %768 = vmatpush1.bf16.msra.mxu0 %v962_v33  ;;  %727 = vmatpush1.bf16.msra.mxu1 %v959_v34  ;;  %v289_v33 = vrot.slane %v280_v26, %v1321_v28 }
  0x20   :  { %769 = vmatprep.subr.bf16.mxu0 %v970_v35  ;;  %728 = vmatprep.subr.bf16.mxu1 %v967_v36 }
  0x23   :  { %770 = vmatpush1.bf16.msra.mxu0 %v968_v37  ;;  %729 = vmatpush1.bf16.msra.mxu1 %v965_v38  ;;  %v297_v37 = vrot.slane %v280_v26, %v296_v29 }
  0x24   :  { %771 = vmatprep.subr.bf16.mxu0 %v976_v39  ;;  %730 = vmatprep.subr.bf16.mxu1 %v973_v40 }
  0x27   :  { %772 = vmatpush1.bf16.msra.mxu0 %v974_v42  ;;  %731 = vmatpush1.bf16.msra.mxu1 %v971_v41 }
  0x28   :  { %773 = vmatprep.subr.bf16.mxu0 %v982_v44  ;;  %732 = vmatprep.subr.bf16.mxu1 %v979_v43 }
  0x2b   :  { %774 = vmatpush1.bf16.msra.mxu0 %v980_v45  ;;  %733 = vmatpush1.bf16.msra.mxu1 %v977_v46 }
  0x2c   :  { %775 = vmatprep.subr.bf16.mxu0 %v988_v47  ;;  %734 = vmatprep.subr.bf16.mxu1 %v985_v48 }
  0x2f   :  { %776 = vmatpush1.bf16.msra.mxu0 %v986_v49  ;;  %735 = vmatpush1.bf16.msra.mxu1 %v983_v50 }
  0x30   :  { %777 = vmatprep.subr.bf16.mxu0 %v994_v51  ;;  %736 = vmatprep.subr.bf16.mxu1 %v991_v52 }
  0x33   :  { %778 = vmatpush1.bf16.msra.mxu0 %v992_v53  ;;  %737 = vmatpush1.bf16.msra.mxu1 %v989_v54 }
  0x34   :  { %779 = vmatprep.subr.bf16.mxu0 %v1000_v55  ;;  %738 = vmatprep.subr.bf16.mxu1 %v997_v56 }
  0x37   :  { %780 = vmatpush1.bf16.msra.mxu0 %v998_v57  ;;  %739 = vmatpush1.bf16.msra.mxu1 %v995_v58 }
  0x38   :  { %740 = vmatprep.subr.bf16.mxu1 %v1003_v59  ;;  %781 = vmatprep.subr.bf16.mxu0 %v1006_v60 }
  0x3b   :  { %741 = vmatpush1.bf16.msra.mxu1 %v1001_v61  ;;  %782 = vmatpush1.bf16.msra.mxu0 %v1004_v62  ;;  %v386_v62 = vld [vmem:[%s1347_s6] sm:$0x3] }
  0x3c   :  { %742 = vmatprep.subr.bf16.mxu1 %v1009_v0  ;;  %783 = vmatprep.subr.bf16.mxu0 %v1012_v2  ;;  %v395_v0 = vrot.slane %v386_v62, %v1321_v28 }
  0x3f   :  { %743 = vmatpush1.bf16.msra.mxu1 %v1007_v63  ;;  %784 = vmatpush1.bf16.msra.mxu0 %v1010_v1  ;;  %v391_v63 = vrot.slane %v386_v62, %v1316_v25 }
  0x40   :  { %744 = vmatprep.subr.bf16.mxu1 %v1015_v3  ;;  %785 = vmatprep.subr.bf16.mxu0 %v1018_v4 }
  0x43   :  { %745 = vmatpush1.bf16.msra.mxu1 %v1013_v5  ;;  %786 = vmatpush1.bf16.msra.mxu0 %v1016_v6  ;;  %v806_v5 = vld [vmem:[%s1348_s7] sm:$0x3] }
  0x44   :  { %746 = vmatprep.subr.bf16.mxu1 %v1021_v7  ;;  %787 = vmatprep.subr.bf16.mxu0 %v1024_v8  ;;  %v815_v16 = vrot.slane %v806_v5, %v1321_v28 }
  0x47   :  { %747 = vmatpush1.bf16.msra.mxu1 %v1019_v9  ;;  %788 = vmatpush1.bf16.msra.mxu0 %v1022_v10 }
  0x48   :  { %748 = vmatprep.subr.bf16.mxu1 %v1027_v11  ;;  %789 = vmatprep.subr.bf16.mxu0 %v1030_v12 }
  0x4b   :  { %749 = vmatpush1.bf16.msra.mxu1 %v1025_v13  ;;  %790 = vmatpush1.bf16.msra.mxu0 %v1028_v14  ;;  %v811_v14 = vrot.slane %v806_v5, %v1316_v25 }
  0xd9   :  { %v106_v17 = vpop.f32.mrb[0].mxu0  ;;  %v147_v18 = vpop.f32.mrb[0].mxu1 }
  0xda   :  { %v108_v19 = vpop.f32.mrb[1].mxu0  ;;  %v149_v20 = vpop.f32.mrb[1].mxu1 }
  0xdb   :  { %v110_v21 = vpop.f32.mrb[2].mxu0  ;;  %v151_v22 = vpop.f32.mrb[2].mxu1 }
  0xdc   :  { %v111_v23 = vpop.f32.mrb[3].mxu0  ;;  %v152_v24 = vpop.f32.mrb[3].mxu1 }
  0xdd   :  { %v824_v23 = vstv %s1349_s8 }
  0xe1   :  { %v232_v31 = vpop.f32.mrb[4].mxu0  ;;  %v273_v35 = vpop.f32.mrb[4].mxu1 }
  0xe2   :  { %v233_v34 = vadd.f32 %v232_v31, %v106_v17  ;;  %v234_v36 = vpop.f32.mrb[5].mxu0  ;;  %v274_v38 = vadd.f32 %v273_v35, %v147_v18  ;;  %v275_v40 = vpop.f32.mrb[5].mxu1 }
  0xe3   :  { %v235_v39 = vadd.f32 %v234_v36, %v108_v19  ;;  %v236_v41 = vpop.f32.mrb[6].mxu0  ;;  %v276_v43 = vadd.f32 %v275_v40, %v149_v20  ;;  %v277_v44 = vpop.f32.mrb[6].mxu1 }
  0xe4   :  { %v302_v42 = vadd.f32 %v285_v30, %v233_v34  ;;  %v237_v45 = vpop.f32.mrb[7].mxu0  ;;  %v304_v46 = vadd.f32 %v293_v32, %v274_v38  ;;  %v278_v48 = vpop.f32.mrb[7].mxu1 }
  0xe5   :  { %v303_v47 = vadd.f32 %v289_v33, %v235_v39  ;;  %v305_v50 = vadd.f32 %v297_v37, %v276_v43 }
  0xe6   :  { %vm306_vm2 = vcmp.gt.f32.partialorder %v302_v42, 0.0  ;;  %v310_v49 = vmul.f32 0.2, %v302_v42  ;;  %vm308_vm3 = vcmp.gt.f32.partialorder %v304_v46, 0.0  ;;  %v312_v51 = vmul.f32 0.2, %v304_v46 }
  0xe7   :  { %v311_v52 = vmul.f32 0.2, %v303_v47  ;;  %vm307_vm4 = vcmp.gt.f32.partialorder %v303_v47, 0.0  ;;  %v313_v54 = vmul.f32 0.2, %v305_v50  ;;  %vm309_vm5 = vcmp.gt.f32.partialorder %v305_v50, 0.0 }
  0xe8   :  { %v314_v53 = vsel %vm306_vm2, %v302_v42, %v310_v49  ;;  %v316_v55 = vsel %vm308_vm3, %v304_v46, %v312_v51 }
  0xe9   :  { %v315_v56 = vsel %vm307_vm4, %v303_v47, %v311_v52  ;;  %v317_v58 = vsel %vm309_vm5, %v305_v50, %v313_v54  ;;  %v318_v59 = vpack.c.bf16 %v314_v53, %v314_v53  ;;  %v320_v61 = vpack.c.bf16 %v316_v55, %v316_v55 }
  0xea   :  { %v319_v57 = vpack.c.bf16 %v315_v56, %v315_v56  ;;  %v321_v60 = vpack.c.bf16 %v317_v58, %v317_v58 }
  0xec   :  { %750 = vmatprep.mubr.bf16.mxu1 %v319_v57  ;;  %791 = vmatprep.mubr.bf16.mxu0 %v321_v60 }
  0xed   :  { %751 = vmatmul.mubr.bf16.vlgmr.msra.gmra.mrb[8].mxu1 %v318_v59  ;;  %792 = vmatmul.mubr.bf16.vlgmr.msra.gmra.mrb[8].mxu0 %v320_v61 }
 0x1c0   :  { %v752_v1 = vpop.f32.mrb[8].mxu1  ;;  %v793_v3 = vpop.f32.mrb[8].mxu0 }
 0x1c1   :  { %v753_v2 = vadd.f32 %v752_v1, %v391_v63  ;;  %v754_v4 = vpop.f32.mrb[9].mxu1  ;;  %v795_v7 = vpop.f32.mrb[9].mxu0 }
 0x1c2   :  { %v755_v6 = vadd.f32 %v754_v4, %v395_v0  ;;  %v756_v8 = vpop.f32.mrb[10].mxu1  ;;  %v797_v10 = vpop.f32.mrb[10].mxu0 }
 0x1c3   :  { %v794_v9 = vadd.f32 %v793_v3, %v753_v2  ;;  %v757_v11 = vpop.f32.mrb[11].mxu1  ;;  %v798_v13 = vpop.f32.mrb[11].mxu0 }
 0x1c4   :  { %v796_v12 = vadd.f32 %v795_v7, %v755_v6 }
 0x1c5   :  { %vm800_vm6 = vcmp.gt.f32.partialorder %v794_v9, 0.0  ;;  %v802_v15 = vmul.f32 0.2, %v794_v9 }
 0x1c6   :  { %vm801_vm7 = vcmp.gt.f32.partialorder %v796_v12, 0.0  ;;  %v803_v17 = vmul.f32 0.2, %v796_v12 }
 0x1c7   :  { %v804_v18 = vsel %vm800_vm6, %v794_v9, %v802_v15 }
 0x1c8   :  { %v805_v19 = vsel %vm801_vm7, %v796_v12, %v803_v17  ;;  %v818_v20 = vmul.f32 %v811_v14, %v804_v18 }
 0x1c9   :  { %v819_v21 = vmul.f32 %v815_v16, %v805_v19 }
 0x1cb   :  { %v820_v22 = vadd.f32 %v819_v21, %v818_v20 }
 0x1cd   :  { %821 = vadd.xlane.f32.xlu0 %v820_v22 }
 0x25a   :  { %v822_v24 = vpop.xlane.xlu0 %821 }
 0x25b   :  { %v825_v26 = vadd.f32 %v824_v23, %v822_v24 }
 0x25d   :  { %827 = vst.msk [vmem:[%s1350_s9] sm:$0xff] %vm826_vm8, %v825_v26 }

</bundles_post_ra>
